<compile_context>
chip_gen: v6e
topology: v6e:2x2x1
jax: 0.10.0
libtpu: 0.0.40
codegen_flags: <defaults>
</compile_context>

<pallas_src>
import functools

import jax
import jax.numpy as jnp
from jax import lax
from jax.experimental import pallas as pl
from jax.experimental.pallas import tpu as pltpu

_NEG = -1e30  # finite "minus infinity" (avoids inf/NaN corner cases)


def _round_up(x, m):
    return (x + m - 1) // m * m


# ----------------------------------------------------------------------------
# Pallas kernels
# ----------------------------------------------------------------------------
def _affine_kernel(x_ref, wm_ref, wt_ref, b_ref, inv_ref, out_ref, acc_sc):
    # grid = (N, S_tiles). Per-sample weighted reduction (no sel matmul):
    #   x_ref:   (1, TS, H) bf16   rows of sample n
    #   wm_ref:  (1, TS, 1) f32    0/1 seq_len_to_mask weights
    #   wt_ref:  (H, H)     bf16   linear weight pre-transposed to (in, out)
    #   b_ref:   (1, H)     f32
    #   inv_ref: (1, 1, 1)  f32    1 / length  (applied once at finalize)
    #   out_ref: (1, 1, H)  f32
    s = pl.program_id(1)

    @pl.when(s == 0)
    def _():
        acc_sc[...] = jnp.zeros_like(acc_sc)

    h = jnp.dot(x_ref[0], wt_ref[...], preferred_element_type=jnp.float32)
    h = jnp.maximum(h + b_ref[...], 0.0)                      # relu(linear), f32
    # VPU weighted sum (keeps f32 precision; O(TS*H) instead of O(N*S*H) MXU)
    acc_sc[...] += jnp.sum(h * wm_ref[0], axis=0, keepdims=True)

    @pl.when(s == pl.num_programs(1) - 1)
    def _():
        out_ref[0] = acc_sc[...] * inv_ref[0]


def _nll_kernel(x_ref, w_ref, t_ref, nll_ref, m_sc, l_sc, tl_sc, *,
                tile_v, vocab_size, vocab_pad):
    # grid = (row_tiles, vocab_tiles); online logsumexp over the vocab axis.
    # x_ref: (TILE_R, H) bf16, w_ref: (H, TILE_V) bf16 (scale folded in),
    # t_ref: (TILE_R, 1) int32, nll_ref: (TILE_R, 1) f32 (per-token raw nll).
    v = pl.program_id(1)

    @pl.when(v == 0)
    def _():
        m_sc[...] = jnp.full_like(m_sc, _NEG)
        l_sc[...] = jnp.zeros_like(l_sc)
        tl_sc[...] = jnp.zeros_like(tl_sc)

    logits = jnp.dot(x_ref[...], w_ref[...], preferred_element_type=jnp.float32)
    col = lax.broadcasted_iota(jnp.int32, logits.shape, 1) + v * tile_v
    if vocab_pad != vocab_size:          # mask the padded vocab columns
        logits = jnp.where(col < vocab_size, logits, _NEG)

    tgt = t_ref[...]                                             # (TILE_R, 1)
    tl_sc[...] += jnp.sum(jnp.where(col == tgt, logits, 0.0),
                          axis=-1, keepdims=True)
    m_old = m_sc[...]
    m_new = jnp.maximum(m_old, jnp.max(logits, axis=-1, keepdims=True))
    l_sc[...] = (l_sc[...] * jnp.exp(m_old - m_new)
                 + jnp.sum(jnp.exp(logits - m_new), axis=-1, keepdims=True))
    m_sc[...] = m_new

    @pl.when(v == pl.num_programs(1) - 1)
    def _():
        nll_ref[...] = (m_sc[...] + jnp.log(l_sc[...])) - tl_sc[...]


def _bleu_sim_kernel(ref_ref, sys_ref, sys_m_ref, out_ref, *, n_chunks, chunk):
    # ref mask is pre-folded into the keys (-1 sentinel never matches a valid
    # sys key); sys mask is applied AFTER the max.  The ref axis is walked in
    # <=128-key chunks with a running (K, S2c) max accumulator, so the live
    # intermediate is capped at (K, S2c, chunk).
    sk3 = sys_ref[0][:, :, None]              # (K, S2c, 1) int32
    rk = ref_ref[0]                           # (1, S1c_pad) int32
    sm = sys_m_ref[0]                         # (K, S2c) f32
    best = jnp.zeros_like(sm)                 # running max over ref n-grams
    for c in range(n_chunks):                 # static, unrolled
        rc = rk[:, c * chunk:(c + 1) * chunk]                  # (1, chunk)
        eq = (sk3 == rc[None, :, :]).astype(jnp.float32)       # (K, S2c, chunk)
        best = jnp.maximum(best, jnp.max(eq, axis=-1))
    out_ref[0] = jnp.sum(best * sm, axis=-1, keepdims=True)    # (K, 1)


def _cos_kernel(enc_ref, dec_ref, out_ref):
    # enc_ref: (1, 1, H), dec_ref: (1, M, H), out_ref: (1, M, 1); grid over B.
    e = enc_ref[0]                                   # (1, H)
    d = dec_ref[0]                                   # (M, H)
    num = jnp.sum(d * e, axis=-1, keepdims=True)     # (M, 1)
    en2 = jnp.sum(e * e, axis=-1, keepdims=True)     # (1, 1)
    dn2 = jnp.sum(d * d, axis=-1, keepdims=True)     # (M, 1)
    inv = lax.rsqrt(jnp.maximum(en2, 1e-16)) * lax.rsqrt(jnp.maximum(dn2, 1e-16))
    out_ref[0] = num * inv


# ----------------------------------------------------------------------------
# Pallas wrappers
# ----------------------------------------------------------------------------
def pallas_affine(x, padding_mask, w_t_bf16, bias_row):
    """affine_transformation: grid over samples, S tiled, VPU weighted sum.

    x: (N, S, H) f32, padding_mask: (N, S) bool/float.  Returns (N, H) f32.
    """
    N, S, H = x.shape
    mask = padding_mask.astype(jnp.float32)
    length = jnp.maximum(jnp.sum(mask, axis=1) - 1.0, 1.0)          # (N,)
    pos = jnp.arange(S, dtype=jnp.float32)[None, :]
    new_mask = (pos < length[:, None]).astype(jnp.float32)          # (N, S)
    inv_len = (1.0 / length).reshape(N, 1, 1)

    # Tile the sequence axis (keeps per-step VMEM bounded at production S).
    S_pad8 = _round_up(S, 8)
    if S_pad8 > 512:
        TS = 512
        S_pad = _round_up(S, TS)
    else:
        TS = S_pad8
        S_pad = S_pad8
    ns = S_pad // TS

    x_b = x.astype(jnp.bfloat16)
    if S_pad != S:
        x_b = jnp.pad(x_b, ((0, 0), (0, S_pad - S), (0, 0)))
        new_mask = jnp.pad(new_mask, ((0, 0), (0, S_pad - S)))
    wm = new_mask.reshape(N, S_pad, 1)

    out = pl.pallas_call(
        _affine_kernel,
        out_shape=jax.ShapeDtypeStruct((N, 1, H), jnp.float32),
        grid=(N, ns),
        in_specs=[
            pl.BlockSpec((1, TS, H), lambda n, s: (n, s, 0)),
            pl.BlockSpec((1, TS, 1), lambda n, s: (n, s, 0)),
            pl.BlockSpec((H, H), lambda n, s: (0, 0)),
            pl.BlockSpec((1, H), lambda n, s: (0, 0)),
            pl.BlockSpec((1, 1, 1), lambda n, s: (n, 0, 0)),
        ],
        out_specs=pl.BlockSpec((1, 1, H), lambda n, s: (n, 0, 0)),
        scratch_shapes=[pltpu.VMEM((1, H), jnp.float32)],
        compiler_params=pltpu.CompilerParams(
            dimension_semantics=("parallel", "arbitrary")),
    )(x_b, wm, w_t_bf16, bias_row, inv_len)
    return out.reshape(N, H)


def pallas_nll(dec_hidden, lm_w_t, targets, ignore_index, vocab_size, tile_v):
    """lm_head projection + cross-entropy (mean over non-ignored tokens)."""
    B, S, H = dec_hidden.shape
    R = B * S
    V_pad = lm_w_t.shape[1]
    nv = V_pad // tile_v
    x2 = dec_hidden.reshape(R, H).astype(jnp.bfloat16)
    tgt = targets.reshape(R, 1).astype(jnp.int32)

    # Large row tiles amortize the (H, tile_v) lm_head block re-streaming; at
    # small R force >=2 row blocks so both v7x TensorCores get work.
    if R >= 2048:
        tile_r = 1024
    elif R >= 1024:
        tile_r = 512
    else:
        tile_r = max(8, _round_up((R + 1) // 2, 8))
    R_pad = _round_up(R, tile_r)
    if R_pad != R:
        x2 = jnp.pad(x2, ((0, R_pad - R), (0, 0)))
        tgt = jnp.pad(tgt, ((0, R_pad - R), (0, 0)),
                      constant_values=ignore_index)
    nr = R_pad // tile_r

    kern = functools.partial(_nll_kernel, tile_v=tile_v,
                             vocab_size=vocab_size, vocab_pad=V_pad)
    nll = pl.pallas_call(
        kern,
        out_shape=jax.ShapeDtypeStruct((R_pad, 1), jnp.float32),
        grid=(nr, nv),
        in_specs=[
            pl.BlockSpec((tile_r, H), lambda r, v: (r, 0)),
            pl.BlockSpec((H, tile_v), lambda r, v: (0, v)),
            pl.BlockSpec((tile_r, 1), lambda r, v: (r, 0)),
        ],
        out_specs=pl.BlockSpec((tile_r, 1), lambda r, v: (r, 0)),
        scratch_shapes=[pltpu.VMEM((tile_r, 1), jnp.float32) for _ in range(3)],
        compiler_params=pltpu.CompilerParams(
            dimension_semantics=("parallel", "arbitrary"),
            vmem_limit_bytes=48 * 1024 * 1024),
    )(x2, lm_w_t, tgt)

    nll = nll[:R, 0]
    valid = (targets.reshape(R) != ignore_index).astype(jnp.float32)
    return jnp.sum(nll * valid) / jnp.maximum(jnp.sum(valid), 1.0)


def pallas_bleu_sim(ref_keys, sys_keys, sys_ngram_mask, *, chunk=128):
    """Packed n-gram match / max / sum reduction of torch_bleu.

    ref_keys already has the ref n-gram mask folded in as a -1 sentinel.
    """
    B, K, S2c = sys_keys.shape
    S1c = ref_keys.shape[-1]
    if S1c > chunk:
        S1c_pad = _round_up(S1c, chunk)
        ref_keys = jnp.pad(ref_keys, ((0, 0), (0, S1c_pad - S1c)),
                           constant_values=-1)
    else:
        chunk = S1c
        S1c_pad = S1c
    n_chunks = S1c_pad // chunk

    kern = functools.partial(_bleu_sim_kernel, n_chunks=n_chunks, chunk=chunk)
    out = pl.pallas_call(
        kern,
        out_shape=jax.ShapeDtypeStruct((B, K, 1), jnp.float32),
        grid=(B,),
        in_specs=[
            pl.BlockSpec((1, 1, S1c_pad), lambda i: (i, 0, 0)),
            pl.BlockSpec((1, K, S2c), lambda i: (i, 0, 0)),
            pl.BlockSpec((1, K, S2c), lambda i: (i, 0, 0)),
        ],
        out_specs=pl.BlockSpec((1, K, 1), lambda i: (i, 0, 0)),
        compiler_params=pltpu.CompilerParams(dimension_semantics=("parallel",)),
    )(ref_keys.reshape(B, 1, S1c_pad).astype(jnp.int32),
      sys_keys.astype(jnp.int32),
      sys_ngram_mask.astype(jnp.float32))
    return out.reshape(B, K)


def pallas_cosine(enc_feat, dec_feat):
    """cosine_similarity(enc[:, None, :], dec, dim=-1), gridded over B."""
    B, M, H = dec_feat.shape
    out = pl.pallas_call(
        _cos_kernel,
        out_shape=jax.ShapeDtypeStruct((B, M, 1), jnp.float32),
        grid=(B,),
        in_specs=[
            pl.BlockSpec((1, 1, H), lambda b: (b, 0, 0)),
            pl.BlockSpec((1, M, H), lambda b: (b, 0, 0)),
        ],
        out_specs=pl.BlockSpec((1, M, 1), lambda b: (b, 0, 0)),
        compiler_params=pltpu.CompilerParams(dimension_semantics=("parallel",)),
    )(enc_feat.reshape(B, 1, H).astype(jnp.float32),
      dec_feat.astype(jnp.float32))
    return out.reshape(B, M)


# ----------------------------------------------------------------------------
# Model (JAX glue around the Pallas kernels)
# ----------------------------------------------------------------------------
def _ngram_keys(x, n, base):
    # x: (..., S) int32 -> (..., S-n+1) int32 packed n-gram keys.
    S = x.shape[-1]
    key = x[..., :S - n + 1]
    for j in range(1, n):
        key = key * base + x[..., j:S - n + 1 + j]
    return key


class CoNTGeneratorPallas:
    def __init__(self, pad_id, args, key):
        self.pad_id = pad_id
        self.args = args
        self.hidden_size = H = args.hidden_size
        self.vocab_size = V = args.vocab_size
        self.model_dim = H
        self.ignore_index = args.ignore_index

        k = jax.random.split(key, 6)
        # TODO(synk): the pretrained T5/Pegasus weights are replaced by
        # deterministic synthetic parameters (no checkpoint loading).
        self.embedding = 0.02 * jax.random.normal(k[0], (V, H), jnp.float32)
        self.enc_w = jax.random.normal(k[1], (H, H), jnp.float32) / (H ** 0.5)
        self.dec_w = jax.random.normal(k[2], (H, H), jnp.float32) / (H ** 0.5)
        limit = (6.0 / (H + H)) ** 0.5          # xavier_uniform for linear_layer
        linear_w = jax.random.uniform(k[3], (H, H), jnp.float32, -limit, limit)
        self.linear_b = jnp.zeros((H,), jnp.float32)
        lm_head_w = 0.02 * jax.random.normal(k[4], (V, H), jnp.float32)
        self._cand_key = k[5]

        # Pre-transposed / pre-cast weights (no per-forward transposes):
        self.linear_wT = linear_w.T.astype(jnp.bfloat16)        # (H, H)
        self.linear_b_row = self.linear_b.reshape(1, H)
        scale = self.model_dim ** (-0.5)                        # fold into weight
        self.tile_v = min(2048, _round_up(V, 128))
        v_pad = _round_up(V, self.tile_v)
        # TODO(synk): optional fp8 lm_head quantization for v7x (validate CE
        # accuracy first); kept bf16 here for exactness across generations.
        lm_wT = (lm_head_w.T * scale).astype(jnp.bfloat16)      # (H, V)
        self.lm_head_wT = jnp.pad(lm_wT, ((0, 0), (0, v_pad - V)))

    # ---- pretrained-model stand-ins -------------------------------------
    def _encoder(self, ids, mask):
        # TODO(synk): stand-in for the HF T5 encoder (no Pallas equivalent).
        emb = self.embedding[ids]                                   # (B, S, H)
        return jnp.tanh(emb @ self.enc_w) * mask.astype(jnp.float32)[..., None]

    def _decoder(self, ids, mask, enc_h, enc_mask):
        # TODO(synk): stand-in for the HF T5 decoder (no Pallas equivalent).
        emb = self.embedding[ids]                                   # (B, S, H)
        m = enc_mask.astype(jnp.float32)[..., None]
        ctx = jnp.sum(enc_h * m, axis=1) / jnp.maximum(jnp.sum(m, axis=1), 1.0)
        h = emb + ctx[:, None, :]
        return jnp.tanh(h @ self.dec_w) * mask.astype(jnp.float32)[..., None]

    def sample_from_model(self, src_inp, src_pad_mask):
        # TODO(synk): diverse beam-search generation has no Pallas equivalent;
        # replaced by a deterministic synthetic candidate sampler.
        B = src_inp.shape[0]
        K = self.args.beam_size
        L = self.args.max_length + 2
        ids = jax.random.randint(self._cand_key, (B, K, L), 1, self.vocab_size)
        pos = jnp.arange(L)[None, None, :]
        keep_len = 4 + (jnp.arange(K) % 5)[None, :, None] + jnp.arange(B)[:, None, None]
        return jnp.where(pos < keep_len, ids, self.pad_id).astype(jnp.int32)

    # ---- module methods ---------------------------------------------------
    def affine_transformation(self, input_features, padding_mask):
        return pallas_affine(input_features, padding_mask,
                             self.linear_wT, self.linear_b_row)

    def padin2max_len(self, t, max_len):
        pad = jnp.full((t.shape[0], max_len - t.shape[-1]), self.pad_id, t.dtype)
        return jnp.concatenate([t, pad], axis=-1)

    def pad2max_len(self, t, max_len):
        pad = jnp.full((t.shape[0], t.shape[1], max_len - t.shape[-1]),
                       self.pad_id, t.dtype)
        return jnp.concatenate([t, pad], axis=-1)

    def torch_bleu(self, ref_tensor, sys_tensor, pad_id, n_gram=2):
        B, K, S2 = sys_tensor.shape
        S1 = ref_tensor.shape[1]
        n = min(min(n_gram, S1), S2)

        ref_padding = (ref_tensor != pad_id).astype(jnp.float32)
        ref_padding = ref_padding.at[:, 0].set(1.0)
        ar1 = jnp.arange(S1, dtype=jnp.float32)[None, :] * jnp.ones_like(ref_padding)
        ref_ngram_mask = jnp.where(
            ar1 < jnp.sum(ref_padding, -1, keepdims=True) - n + 1,
            ref_padding, jnp.zeros_like(ref_padding))[:, :S1 - n + 1]

        sys_padding = (sys_tensor != pad_id).astype(jnp.float32)
        sys_padding = sys_padding.at[:, 0].set(1.0)   # faithful to original code
        ar2 = jnp.arange(S2, dtype=jnp.float32)[None, None, :] * jnp.ones_like(sys_padding)
        sys_ngram_mask = jnp.where(
            ar2 < jnp.sum(sys_padding, -1, keepdims=True) - n + 1,
            sys_padding, jnp.zeros_like(sys_padding))[:, :, :S2 - n + 1]

        # pack each n-gram into a single int32 key (exact while n*log2(V) < 31)
        # TODO(synk): for larger n / vocab use a 32-bit hashed key instead.
        ref_ids = (ref_tensor * ref_padding.astype(ref_tensor.dtype)).astype(jnp.int32)
        sys_ids = (sys_tensor * sys_padding.astype(sys_tensor.dtype)).astype(jnp.int32)
        base = jnp.int32(self.vocab_size)
        ref_keys = _ngram_keys(ref_ids, n, base)                 # (B, S1c)
        sys_keys = _ngram_keys(sys_ids, n, base)                 # (B, K, S2c)
        # fold the ref n-gram mask into the keys: sentinel -1 never matches
        ref_keys = jnp.where(ref_ngram_mask > 0, ref_keys, jnp.int32(-1))

        sim = pallas_bleu_sim(ref_keys, sys_keys, sys_ngram_mask)

        ref_len = jnp.sum(ref_padding, -1, keepdims=True)        # (B, 1)
        sys_len = jnp.sum(sys_padding, -1) + 1                   # (B, K)
        bp = jnp.exp(1.0 - ref_len / sys_len)
        bp = jnp.where(ref_len >= sys_len, bp, jnp.ones_like(bp))
        denom = jnp.maximum(jnp.sum(sys_ngram_mask, -1), 1.0)    # div-by-zero guard
        return sim / denom * bp

    def ranking_loss(self, cos_distance, bleu_distance):
        margin = 0.01
        total_loss = jnp.mean(jnp.maximum(0.0, -(cos_distance - cos_distance)))  # 0
        n = cos_distance.shape[1]
        for i in range(1, n):
            pos = cos_distance[:, :-i]
            neg = cos_distance[:, i:]
            same_mask = (jnp.abs(bleu_distance[:, :-i] - bleu_distance[:, i:]) > margin
                         ).astype(jnp.float32)
            marginal = jnp.maximum(0.0, -(pos - neg) + margin * i)
            s = jnp.sum(same_mask)
            total_loss = total_loss + jnp.where(
                s > 0, jnp.sum(marginal * same_mask) / jnp.maximum(s, 1.0), 0.0)
        return total_loss

    # ---- forward ------------------------------------------------------------
    def forward(self, src_inp, target_inp, target_outp):
        pad_id = self.pad_id
        batch_size = src_inp.shape[0]
        src_pad_mask = src_inp != pad_id
        encoder_hidden_states = self._encoder(src_inp, src_pad_mask)

        if target_inp.shape[1] < self.args.max_length:
            target_inp = self.padin2max_len(target_inp, self.args.max_length + 2)
        if target_outp.shape[1] < self.args.max_length:
            target_outp = self.padin2max_len(target_outp, self.args.max_length + 2)

        tgt_pad_mask = (target_inp != pad_id).at[:, 0].set(True)
        decoder_out = self._decoder(target_inp, tgt_pad_mask,
                                    encoder_hidden_states, src_pad_mask)
        nll_loss = pallas_nll(decoder_out, self.lm_head_wT, target_outp,
                              self.ignore_index, self.vocab_size, self.tile_v)
        if self.args.warmup:
            return {'loss': nll_loss}

        cand_ids = self.sample_from_model(src_inp, src_pad_mask)     # (B, beam, L)
        samples_from_batch = jnp.broadcast_to(
            target_inp[None, :, :], (batch_size, batch_size, target_inp.shape[1]))
        cand_len = cand_ids.shape[2]
        samples_len = samples_from_batch.shape[2]
        if samples_len < cand_len:
            samples_from_batch = self.pad2max_len(samples_from_batch, cand_len)
        else:
            samples_from_batch = samples_from_batch[:, :, :cand_len]
        samples_all = jnp.concatenate([cand_ids, samples_from_batch], axis=1)

        actual_distance = self.torch_bleu(target_inp, samples_all, pad_id,
                                          self.args.n_gram)
        distance_mask = actual_distance < 0.99
        actual_distance_masked = actual_distance * distance_mask.astype(jnp.float32)

        sample_num = min(self.args.max_sample_num - 1,
                         actual_distance_masked.shape[1] - 1)
        order = jnp.argsort(-actual_distance_masked, axis=-1)
        actual_distance_sorted = jnp.take_along_axis(actual_distance_masked, order, -1)
        sampled_actual_distance = actual_distance_sorted[:, :sample_num]
        sampled_actual_indices = order[:, :sample_num]
        self_indices = jnp.arange(batch_size, dtype=jnp.int32).reshape(batch_size, 1) \
            + cand_ids.shape[1]
        sampled_indices = jnp.concatenate([self_indices, sampled_actual_indices], -1)
        self_distance = jnp.full((batch_size, 1), 1.0, jnp.float32)
        sampled_bleu_distance = jnp.concatenate([self_distance,
                                                 sampled_actual_distance], -1)
        sampled_input = jnp.take_along_axis(samples_all,
                                            sampled_indices[:, :, None], axis=1)

        # Batch ALL sampled sequences into a single decoder + affine call.
        num_samples = sampled_indices.shape[-1]
        L = sampled_input.shape[-1]
        samp = jnp.moveaxis(sampled_input, 1, 0).reshape(num_samples * batch_size, L)
        samp_mask = (samp != pad_id).at[:, 0].set(True)
        enc_rep = jnp.tile(encoder_hidden_states, (num_samples, 1, 1))
        src_mask_rep = jnp.tile(src_pad_mask, (num_samples, 1))
        d_out = self._decoder(samp, samp_mask, enc_rep, src_mask_rep)
        feats = self.affine_transformation(d_out, samp_mask)        # (nS*B, H)
        decoder_feature = jnp.moveaxis(
            feats.reshape(num_samples, batch_size, self.hidden_size), 0, 1)

        encoder_feature = self.affine_transformation(encoder_hidden_states,
                                                     src_pad_mask)
        cos_distance = pallas_cosine(encoder_feature, decoder_feature)
        cl_loss = self.ranking_loss(cos_distance, sampled_bleu_distance)
        return {'loss': nll_loss + 1.0 * cl_loss, 'cl_loss': cl_loss}


# ----------------------------------------------------------------------------
if __name__ == "__main__":
    class Args:
        pass

    args = Args()
    args.max_length = 8
    args.ignore_index = 0
    args.warmup = False
    args.n_gram = 2
    args.max_sample_num = 4
    args.beam_size = 3
    args.hidden_size = 32
    args.vocab_size = 128

    key = jax.random.PRNGKey(0)
    k_params, k_src, k_tgt = jax.random.split(key, 3)

    model = CoNTGeneratorPallas(pad_id=0, args=args, key=k_params)

    B, S_src, S_tgt = 2, 8, 6
    src_inp = jax.random.randint(k_src, (B, S_src), 1, args.vocab_size, jnp.int32)
    src_inp = src_inp.at[:, -1].set(0)                       # one pad token at the end
    target_inp = jax.random.randint(k_tgt, (B, S_tgt), 1, args.vocab_size, jnp.int32)
    target_outp = jnp.concatenate(
        [target_inp[:, 1:], jnp.zeros((B, 1), jnp.int32)], axis=-1)

    out = model.forward(src_inp, target_inp, target_outp)
    loss = jax.block_until_ready(out['loss'])
    cl = jax.block_until_ready(out['cl_loss'])
    assert jnp.isfinite(loss) and jnp.isfinite(cl)
    print("KERNEL_OK")
</pallas_src>

<mosaic_0001>
module attributes {stable_mosaic.version = 11 : i64} {
  func.func @_nll_kernel(%arg0: i32, %arg1: i32, %arg2: memref<16x32xbf16, #tpu.memory_space<vmem>>, %arg3: memref<32x128xbf16, #tpu.memory_space<vmem>>, %arg4: memref<16x1xi32, #tpu.memory_space<vmem>>, %arg5: memref<16x1xf32, #tpu.memory_space<vmem>>, %arg6: memref<16x1xf32, #tpu.memory_space<vmem>>, %arg7: memref<16x1xf32, #tpu.memory_space<vmem>>, %arg8: memref<16x1xf32, #tpu.memory_space<vmem>>) attributes {dimension_semantics = [#tpu.dimension_semantics<parallel>, #tpu.dimension_semantics<arbitrary>], iteration_bounds = array<i64: 2, 1>, scalar_prefetch = 0 : i64, scratch_operands = 3 : i64, tpu.core_type = #tpu.core_type<tc>, window_params = [{transform_indices = @transform_0, window_bounds = array<i64: 16, 32>}, {transform_indices = @transform_1, window_bounds = array<i64: 32, 128>}, {transform_indices = @transform_2, window_bounds = array<i64: 16, 1>}, {transform_indices = @transform_3, window_bounds = array<i64: 16, 1>}]} {
    %c0_i32 = arith.constant 0 : i32
    %0 = arith.cmpi eq, %arg1, %c0_i32 : i32
    %1 = arith.extui %0 : i1 to i32
    %c0_i32_0 = arith.constant 0 : i32
    %2 = arith.cmpi ne, %1, %c0_i32_0 : i32
    scf.if %2 {
      %cst_24 = arith.constant -1.000000e+30 : f32
      %39 = vector.broadcast %cst_24 : f32 to vector<16x1xf32>
      %c0_25 = arith.constant 0 : index
      %c0_26 = arith.constant 0 : index
      %40 = vector.load %arg6[%c0_25, %c0_26] : memref<16x1xf32, #tpu.memory_space<vmem>>, vector<16x1xf32>
      tpu.vector_store %arg6[%c0_25, %c0_26], %39 {strides = array<i32>} : memref<16x1xf32, #tpu.memory_space<vmem>>, vector<16x1xf32>,
      %cst_27 = arith.constant 0.000000e+00 : f32
      %41 = vector.broadcast %cst_27 : f32 to vector<16x1xf32>
      %c0_28 = arith.constant 0 : index
      %c0_29 = arith.constant 0 : index
      %42 = vector.load %arg7[%c0_28, %c0_29] : memref<16x1xf32, #tpu.memory_space<vmem>>, vector<16x1xf32>
      tpu.vector_store %arg7[%c0_28, %c0_29], %41 {strides = array<i32>} : memref<16x1xf32, #tpu.memory_space<vmem>>, vector<16x1xf32>,
      %cst_30 = arith.constant 0.000000e+00 : f32
      %43 = vector.broadcast %cst_30 : f32 to vector<16x1xf32>
      %c0_31 = arith.constant 0 : index
      %c0_32 = arith.constant 0 : index
      %44 = vector.load %arg8[%c0_31, %c0_32] : memref<16x1xf32, #tpu.memory_space<vmem>>, vector<16x1xf32>
      tpu.vector_store %arg8[%c0_31, %c0_32], %43 {strides = array<i32>} : memref<16x1xf32, #tpu.memory_space<vmem>>, vector<16x1xf32>,
    } else {
    }
    %c0 = arith.constant 0 : index
    %c0_1 = arith.constant 0 : index
    %3 = vector.load %arg2[%c0, %c0_1] : memref<16x32xbf16, #tpu.memory_space<vmem>>, vector<16x32xbf16>
    %c0_2 = arith.constant 0 : index
    %c0_3 = arith.constant 0 : index
    %4 = vector.load %arg3[%c0_2, %c0_3] : memref<32x128xbf16, #tpu.memory_space<vmem>>, vector<32x128xbf16>
    %cst = arith.constant dense<0.000000e+00> : vector<16x128xf32>
    %5 = tpu.matmul %3, %4, %cst {dimension_numbers = #tpu.dot_dimension_numbers<[1], [0], [0], [1], [0, 0, 1, 1], [], []>} : vector<16x32xbf16>, vector<32x128xbf16>, vector<16x128xf32> -> vector<16x128xf32>
    %6 = tpu.iota {dimensions = array<i32: 1>} : vector<16x128xi32>
    %c128_i32 = arith.constant 128 : i32
    %7 = arith.muli %arg1, %c128_i32 : i32
    %8 = vector.broadcast %7 : i32 to vector<16x128xi32>
    %9 = arith.addi %6, %8 : vector<16x128xi32>
    %c0_4 = arith.constant 0 : index
    %c0_5 = arith.constant 0 : index
    %10 = vector.load %arg4[%c0_4, %c0_5] : memref<16x1xi32, #tpu.memory_space<vmem>>, vector<16x1xi32>
    %c0_6 = arith.constant 0 : index
    %c0_7 = arith.constant 0 : index
    %11 = vector.load %arg8[%c0_6, %c0_7] : memref<16x1xf32, #tpu.memory_space<vmem>>, vector<16x1xf32>
    %12 = vector.broadcast %10 : vector<16x1xi32> to vector<16x128xi32>
    %13 = arith.cmpi eq, %9, %12 : vector<16x128xi32>
    %cst_8 = arith.constant 0.000000e+00 : f32
    %14 = vector.broadcast %cst_8 : f32 to vector<16x128xf32>
    %15 = arith.select %13, %5, %14 : vector<16x128xi1>, vector<16x128xf32>
    %cst_9 = arith.constant dense<0.000000e+00> : vector<16xf32>
    %16 = vector.multi_reduction <add>, %15, %cst_9 [1] : vector<16x128xf32> to vector<16xf32>
    %17 = vector.shape_cast %16 : vector<16xf32> to vector<16x1xf32>
    %18 = arith.addf %11, %17 : vector<16x1xf32>
    %c0_10 = arith.constant 0 : index
    %c0_11 = arith.constant 0 : index
    %19 = vector.load %arg8[%c0_10, %c0_11] : memref<16x1xf32, #tpu.memory_space<vmem>>, vector<16x1xf32>
    tpu.vector_store %arg8[%c0_10, %c0_11], %18 {strides = array<i32>} : memref<16x1xf32, #tpu.memory_space<vmem>>, vector<16x1xf32>,
    %c0_12 = arith.constant 0 : index
    %c0_13 = arith.constant 0 : index
    %20 = vector.load %arg6[%c0_12, %c0_13] : memref<16x1xf32, #tpu.memory_space<vmem>>, vector<16x1xf32>
    %cst_14 = arith.constant dense<0xFF800000> : vector<16xf32>
    %21 = vector.multi_reduction <maximumf>, %5, %cst_14 [1] : vector<16x128xf32> to vector<16xf32>
    %22 = vector.shape_cast %21 : vector<16xf32> to vector<16x1xf32>
    %23 = arith.maximumf %20, %22 : vector<16x1xf32>
    %c0_15 = arith.constant 0 : index
    %c0_16 = arith.constant 0 : index
    %24 = vector.load %arg7[%c0_15, %c0_16] : memref<16x1xf32, #tpu.memory_space<vmem>>, vector<16x1xf32>
    %25 = arith.subf %20, %23 : vector<16x1xf32>
    %26 = math.exp %25 : vector<16x1xf32>
    %27 = arith.mulf %24, %26 : vector<16x1xf32>
    %28 = vector.broadcast %23 : vector<16x1xf32> to vector<16x128xf32>
    %29 = arith.subf %5, %28 : vector<16x128xf32>
    %30 = math.exp %29 : vector<16x128xf32>
    %cst_17 = arith.constant dense<0.000000e+00> : vector<16xf32>
    %31 = vector.multi_reduction <add>, %30, %cst_17 [1] : vector<16x128xf32> to vector<16xf32>
    %32 = vector.shape_cast %31 : vector<16xf32> to vector<16x1xf32>
    %33 = arith.addf %27, %32 : vector<16x1xf32>
    %c0_18 = arith.constant 0 : index
    %c0_19 = arith.constant 0 : index
    %34 = vector.load %arg7[%c0_18, %c0_19] : memref<16x1xf32, #tpu.memory_space<vmem>>, vector<16x1xf32>
    tpu.vector_store %arg7[%c0_18, %c0_19], %33 {strides = array<i32>} : memref<16x1xf32, #tpu.memory_space<vmem>>, vector<16x1xf32>,
    %c0_20 = arith.constant 0 : index
    %c0_21 = arith.constant 0 : index
    %35 = vector.load %arg6[%c0_20, %c0_21] : memref<16x1xf32, #tpu.memory_space<vmem>>, vector<16x1xf32>
    tpu.vector_store %arg6[%c0_20, %c0_21], %23 {strides = array<i32>} : memref<16x1xf32, #tpu.memory_space<vmem>>, vector<16x1xf32>,
    %c0_i32_22 = arith.constant 0 : i32
    %36 = arith.cmpi eq, %arg1, %c0_i32_22 : i32
    %37 = arith.extui %36 : i1 to i32
    %c0_i32_23 = arith.constant 0 : i32
    %38 = arith.cmpi ne, %37, %c0_i32_23 : i32
    scf.if %38 {
      %c0_24 = arith.constant 0 : index
      %c0_25 = arith.constant 0 : index
      %39 = vector.load %arg6[%c0_24, %c0_25] : memref<16x1xf32, #tpu.memory_space<vmem>>, vector<16x1xf32>
      %c0_26 = arith.constant 0 : index
      %c0_27 = arith.constant 0 : index
      %40 = vector.load %arg7[%c0_26, %c0_27] : memref<16x1xf32, #tpu.memory_space<vmem>>, vector<16x1xf32>
      %41 = math.log %40 : vector<16x1xf32>
      %42 = arith.addf %39, %41 : vector<16x1xf32>
      %c0_28 = arith.constant 0 : index
      %c0_29 = arith.constant 0 : index
      %43 = vector.load %arg8[%c0_28, %c0_29] : memref<16x1xf32, #tpu.memory_space<vmem>>, vector<16x1xf32>
      %44 = arith.subf %42, %43 : vector<16x1xf32>
      %c0_30 = arith.constant 0 : index
      %c0_31 = arith.constant 0 : index
      %45 = vector.load %arg5[%c0_30, %c0_31] : memref<16x1xf32, #tpu.memory_space<vmem>>, vector<16x1xf32>
      tpu.vector_store %arg5[%c0_30, %c0_31], %44 {strides = array<i32>} : memref<16x1xf32, #tpu.memory_space<vmem>>, vector<16x1xf32>,
    } else {
    }
    return
  }
  func.func @transform_0(%arg0: i32, %arg1: i32) -> (i32, i32) {
    %c0_i32 = arith.constant 0 : i32
    %c0_i32_0 = arith.constant 0 : i32
    return %arg0, %c0_i32 : i32, i32
  }
  func.func @transform_1(%arg0: i32, %arg1: i32) -> (i32, i32) {
    %c0_i32 = arith.constant 0 : i32
    %c0_i32_0 = arith.constant 0 : i32
    return %c0_i32, %arg1 : i32, i32
  }
  func.func @transform_2(%arg0: i32, %arg1: i32) -> (i32, i32) {
    %c0_i32 = arith.constant 0 : i32
    %c0_i32_0 = arith.constant 0 : i32
    return %arg0, %c0_i32 : i32, i32
  }
  func.func @transform_3(%arg0: i32, %arg1: i32) -> (i32, i32) {
    %c0_i32 = arith.constant 0 : i32
    %c0_i32_0 = arith.constant 0 : i32
    return %arg0, %c0_i32 : i32, i32
  }
}

</mosaic_0001>

<bundles_post_ra>
// kernel: tpu_custom_call.1
= control target key start
LH: loop header
LB: loop body
LE: loop exit
PB: predicated region body
PF: predicated region fallthrough
CT: control target
= control target key end

     0   :  { %s610_s12 = smov 0   ;;  %s612_s13 = smov 0   ;;  %s674_s0 = inlined_call_operand.vmem [shape: bf16[32,32], index: 0, kind: input, shape index: {}]   ;;  %s675_s1 = inlined_call_operand.vmem [shape: bf16[32,128], index: 1, kind: input, shape index: {}]   ;;  %s676_s2 = inlined_call_operand.vmem [shape: s32[32,1], index: 2, kind: input, shape index: {}]   ;;  %s677_s3 = inlined_call_operand.vmem [shape: f32[32,1], index: 3, kind: output, shape index: {}]  }
   0x1   :  { %s614_s14 = smov 0  }
   0x2 LB: > { %s25_s15 = sadd.s32 1, %s580_s13  ;;  %p493_p0 = scmp.ge.s32.totalorder %s584_s14, 1  ;;  %s584_s14 = sphi %s614_s14, %s13_s14   ;;  %s580_s13 = sphi %s612_s13, %s679_s13   ;;  %s576_s12 = sphi %s610_s12, %s678_s12  }
   0x3   : > { %p27_p1 = scmp.ge.s32.totalorder %s25_s15, 2  ;;  %p170_p2 = scmp.lt.s32.totalorder %s584_s14, 3 }
   0x5   : > { %s681_s15 = smov (%p27_p1, %s25_s15), 0  ;;  %p171_p3 = pnand %p493_p0, %p170_p2 }
   0x6   : > { %s494_s20 = sshll.u32 (!%p171_p3), %s576_s12, 1 }
   0x7   : > { %174 = sbr.rel (%p171_p3) target bundleno = 669 (0x29d), region = 32  ;;  %p204_p4 = scmp.lt.s32.totalorder (!%p171_p3), %s494_s20, 3 }
   0xc   : > { %v547_v0 = vld [vmem:[%s675_s1 + $0x8] sm:$0xff]   ;;  %v586_v1 = vmov 0.0   ;;  %v548_v2 = vld [vmem:[%s675_s1] sm:$0xff]   ;;  %vm587_vm0 = vmmov 0   ;;  %s683_s20 = smov (!%p204_p4, %s494_s20), 3  ;;  %vm260_vm1 = vcmask 261120   ;;  %v305_v18 = vlaneseq }
   0xd   : > { %509 = vmatprep.subr.bf16.mxu0 %v586_v1  ;;  %513 = vmatprep.mubr.msk.bf16.mxu0 %vm587_vm0, %v586_v1  ;;  %s495_s21 = sshll.u32 %s683_s20, 2  ;;  %v588_v4 = vmov 0   ;;  %vm230_vm2 = vcmask 7168   ;;  %v589_v5 = vmov -1e+30   ;;  %s497_s25 = sshll.u32 %s683_s20, 3 }
   0xe   : > { %510 = vmatpush3.bf16.msra.mxu0 %v547_v0  ;;  %s207_s24 = scalar_lea.vmem %s674_s0, %s495_s21  ;;  %546 = vset.pattern.permute.xlu0 %v588_v4  ;;  %231 = vst.msk [vmem:[#allocation2] sm:$0xff] %vm230_vm2, %v589_v5  ;;  %232 = vst.msk [vmem:[#allocation2 + $0x8] sm:$0xff] %vm230_vm2, %v589_v5  ;;  %s217_s28 = scalar_lea.vmem %s676_s2, %s497_s25  ;;  %v306_v21 = vand.u32 127, %v305_v18 }
   0xf   : > { %511 = vmatprep.subr.bf16.mxu0 %v586_v1  ;;  %v549_v3 = vld [vmem:[%s207_s24] sm:$0xff]   ;;  %545 = vset.pattern.permute.xlu1 %v588_v4  ;;  %233 = vst.msk [vmem:[#allocation3] sm:$0xff] %vm230_vm2, %v586_v1  ;;  %234 = vst.msk [vmem:[#allocation3 + $0x8] sm:$0xff] %vm230_vm2, %v586_v1  ;;  %v311_v20 = vld [vmem:[%s217_s28 + $0x8] sm:$0xff]  ;;  %s223_s4 = scalar_lea.vmem %s677_s3, %s497_s25 }
  0x10   : > { %235 = vst.msk [vmem:[#allocation4] sm:$0xff] %vm230_vm2, %v586_v1  ;;  %236 = vst.msk [vmem:[#allocation4 + $0x8] sm:$0xff] %vm230_vm2, %v586_v1  ;;  %v310_v10 = vld [vmem:[%s217_s28] sm:$0xff] }
  0x12   : > { %512 = vmatpush3.bf16.msra.mxu0 %v548_v2 }
  0x15   : > { %514 = vmatmul.mubr.msk.bf16.vlgmr.msra.gmra.mxu0 %vm260_vm1, %v549_v3  ;;  %v333_v11 = vld [vmem:[#allocation2] sm:$0xff]  ;;  %v334_v14 = vld [vmem:[#allocation2 + $0x8] sm:$0xff] }
  0x16   : > { %v341_v40 = vld [vmem:[#allocation3] sm:$0xff]  ;;  %v342_v44 = vld [vmem:[#allocation3 + $0x8] sm:$0xff] }
  0x17   : > { %v312_v33 = vld [vmem:[#allocation4] sm:$0xff]  ;;  %v313_v49 = vld [vmem:[#allocation4 + $0x8] sm:$0xff] }
  0xd5   : > { %v298_v6 = vpop.f32.mrf.mxu0 }
  0xd6   : > { %335 = vmax.xlane.f32.xlu0 %v298_v6 }
  0xd7   : > { %v515_v7 = vpop.f32.mrf.mxu0 }
  0xd9   : > { %v301_v8 = vpop.f32.mrf.mxu0 }
  0xda   : > { %337 = vmax.xlane.f32.xlu0 %v301_v8 }
  0xdb   : > { %v516_v9 = vpop.f32.mrf.mxu0 }
  0xf0   : > { %315 = vperm.xlu0 %546, %v310_v10  }
 0x15f   : > { %v336_v12 = vpop.xlane.xlu0 %335 }
 0x160   : > { %v339_v13 = vmax.f32 %v333_v11, %v336_v12 }
 0x162   : > { %v343_v15 = vsub.f32 %v333_v11, %v339_v13  ;;  %375 = vst.msk [vmem:[#allocation2] sm:$0xff] %vm230_vm2, %v339_v13  ;;  %353 = vperm.xlu1 %545, %v339_v13  }
 0x163   : > { %v338_v16 = vpop.xlane.xlu0 %337 }
 0x164   : > { %v340_v17 = vmax.f32 %v334_v14, %v338_v16  ;;  %v345_v37 = vmul.f32 1.442695, %v343_v15 }
 0x166   : > { %v344_v19 = vsub.f32 %v334_v14, %v340_v17  ;;  %376 = vst.msk [vmem:[#allocation2 + $0x8] sm:$0xff] %vm230_vm2, %v340_v17  ;;  %358 = vperm.xlu1 %545, %v340_v17  }
 0x168   : > { %v347_v38 = vmul.f32 1.442695, %v344_v19 }
 0x169   : > { %v380_v56 = vld [vmem:[#allocation2] sm:$0xff] }
 0x16a   : > { %318 = vperm.xlu1 %545, %v311_v20  }
 0x16b   : > { %v316_v22 = vpop.permute.xlu0 %315 }
 0x16c   : > { %vm320_vm3 = vcmp.eq.s32.totalorder %v306_v21, %v316_v22 }
 0x16d   : > { %v322_v23 = vsel %vm320_vm3, %v298_v6, 0.0  ;;  %v381_v62 = vld [vmem:[#allocation2 + $0x8] sm:$0xff] }
 0x16e   : > { %324 = vadd.xlane.f32.xlu0 %v322_v23 }
 0x1dd   : > { %v354_v24 = vpop.permute.xlu1 %353 }
 0x1de   : > { %v361_v25 = vsub.f32 %v298_v6, %v354_v24 }
 0x1e0   : > { %v363_v26 = vmul.f32 1.442695, %v361_v25 }
 0x1e1   : > { %v359_v27 = vpop.permute.xlu1 %358 }
 0x1e2   : > { %550 = vpow2.f32 %v363_v26  ;;  %v362_v28 = vsub.f32 %v301_v8, %v359_v27 }
 0x1e4   : > { %v365_v29 = vmul.f32 1.442695, %v362_v28 }
 0x1e5   : > { %v319_v31 = vpop.permute.xlu1 %318 }
 0x1e6   : > { %552 = vpow2.f32 %v365_v29  ;;  %vm321_vm4 = vcmp.eq.s32.totalorder %v306_v21, %v319_v31 }
 0x1e7   : > { %v323_v35 = vsel %vm321_vm4, %v301_v8, 0.0  ;;  %554 = vpow2.f32 %v345_v37 }
 0x1e8   : > { %556 = vpow2.f32 %v347_v38 }
 0x1ef   : > { %v551_v30 = vpop.eup %550 }
 0x1f0   : > { %367 = vadd.xlane.f32.xlu1 %v551_v30 }
 0x1f3   : > { %v553_v32 = vpop.eup %552 }
 0x1f4   : > { %369 = vadd.xlane.f32.xlu1 %v553_v32  ;;  %v555_v39 = vpop.eup %554 }
 0x1f5   : > { %v349_v41 = vmul.f32 %v555_v39, %v341_v40  ;;  %v557_v42 = vpop.eup %556 }
 0x1f6   : > { %v350_v46 = vmul.f32 %v557_v42, %v342_v44 }
 0x1f7   : > { %v325_v34 = vpop.xlane.xlu0 %324 }
 0x1f8   : > { %v328_v36 = vadd.f32 %v325_v34, %v312_v33  ;;  %326 = vadd.xlane.f32.xlu1 %v323_v35 }
 0x1fa   : > { %331 = vst.msk [vmem:[#allocation4] sm:$0xff] %vm230_vm2, %v328_v36 }
 0x201   : > { %v390_v59 = vld [vmem:[#allocation4] sm:$0xff] }
 0x279   : > { %v368_v43 = vpop.xlane.xlu1 %367 }
 0x27a   : > { %v371_v45 = vadd.f32 %v368_v43, %v349_v41 }
 0x27c   : > { %373 = vst.msk [vmem:[#allocation3] sm:$0xff] %vm230_vm2, %v371_v45 }
 0x27d   : > { %v370_v47 = vpop.xlane.xlu1 %369 }
 0x27e   : > { %v372_v48 = vadd.f32 %v370_v47, %v350_v46 }
 0x280   : > { %374 = vst.msk [vmem:[#allocation3 + $0x8] sm:$0xff] %vm230_vm2, %v372_v48 }
 0x281   : > { %v327_v50 = vpop.xlane.xlu1 %326 }
 0x282   : > { %v329_v51 = vadd.f32 %v327_v50, %v313_v49 }
 0x283   : > { %v382_v52 = vld [vmem:[#allocation3] sm:$0xff] }
 0x284   : > { %558 = vlog2.f32 %v382_v52  ;;  %332 = vst.msk [vmem:[#allocation4 + $0x8] sm:$0xff] %vm230_vm2, %v329_v51 }
 0x287   : > { %v383_v53 = vld [vmem:[#allocation3 + $0x8] sm:$0xff] }
 0x288   : > { %560 = vlog2.f32 %v383_v53 }
 0x28b   : > { %v391_v0 = vld [vmem:[#allocation4 + $0x8] sm:$0xff] }
 0x291   : > { %v559_v54 = vpop.eup %558 }
 0x292   : > { %v385_v55 = vmul.f32 0.6931472, %v559_v54 }
 0x294   : > { %v388_v57 = vadd.f32 %v385_v55, %v380_v56 }
 0x295   : > { %v561_v58 = vpop.eup %560 }
 0x296   : > { %v392_v60 = vsub.f32 %v388_v57, %v390_v59  ;;  %v387_v61 = vmul.f32 0.6931472, %v561_v58 }
 0x298   : > { %394 = vst.msk [vmem:[%s223_s4] sm:$0xff] %vm230_vm2, %v392_v60  ;;  %v389_v63 = vadd.f32 %v387_v61, %v381_v62 }
 0x29a   : > { %v393_v1 = vsub.f32 %v389_v63, %v391_v0 }
 0x29c   : > { %395 = vst.msk [vmem:[%s223_s4 + $0x8] sm:$0xff] %vm230_vm2, %v393_v1 }
 0x29d PF: > { %s13_s14 = sadd.s32 1, %s584_s14   ;;  %s678_s12 = smov %s580_s13 }
 0x29e   : > { %p10_p5 = scmp.ge.s32.totalorder %s13_s14, 4   ;;  %s679_s13 = smov %s681_s15 }
 0x2a0   :  { %12 = sbr.rel (!%p10_p5) target bundleno = 2 (0x2), region = 76 }

</bundles_post_ra>
